<compile_context>
chip_gen: v5e
topology: v5e:2x2
jax: 0.10.0
libtpu: 0.0.40
codegen_flags: <defaults>
</compile_context>

<pallas_src>
import jax
import jax.numpy as jnp
from jax.experimental import pallas as pl
from jax.experimental.pallas import tpu as pltpu

INPUT_SIZE = 4
HIDDEN_SIZE = 10
OUTPUT_SIZE = 3


def _round_up(n, m):
    return ((n + m - 1) // m) * m


def rnn_classifier_kernel(x_ref, wih_ref, whh_ref, b_rnn_ref, wfc_ref, bfc_ref,
                          out_ref, xproj_ref):
    # Batch-in-lanes layout:
    #   x_ref:     (T, I, TB)   time-major, batch on the 128-lane axis
    #   wih_ref:   (H, I)       whh_ref: (H, H)      b_rnn_ref: (H, 1) = b_ih + b_hh
    #   wfc_ref:   (O, H)       bfc_ref: (O, 1)
    #   out_ref:   (O, TB)      logits (lane-dense store)
    #   xproj_ref: (T, H, TB)   VMEM scratch: hoisted input projection
    T = x_ref.shape[0]
    H = xproj_ref.shape[1]
    TB = xproj_ref.shape[2]

    wih = wih_ref[...]
    whh = whh_ref[...]
    b_rnn = b_rnn_ref[...]

    # ---- Hoisted input projection (off the serial recurrence chain). ----
    # One timestep per chunk so only a single (H, TB) slab is live at once
    # (bounds vreg pressure; no reshape / relayout of the raw input block).
    def project(t):
        xproj_ref[t] = (
            jnp.dot(wih, x_ref[t], preferred_element_type=jnp.float32) + b_rnn
        )

    if T <= 32:
        for t in range(T):                      # static -> fully unrolled
            project(t)
    else:
        def proj_body(t, carry):
            project(t)
            return carry
        jax.lax.fori_loop(0, T, proj_body, 0, unroll=8)

    # ---- Recurrence: h_t = tanh(xproj_t + W_hh @ h_{t-1}), h as (H, TB). ----
    # Only the tiny (H, H) @ (H, TB) lane-dense matmul + one tanh sit on the
    # serial per-step chain.
    h0 = jnp.zeros((H, TB), dtype=jnp.float32)

    def step(t, h):
        return jnp.tanh(
            xproj_ref[t] + jnp.dot(whh, h, preferred_element_type=jnp.float32)
        )

    if T <= 32:
        h = h0
        for t in range(T):                      # static -> fully unrolled
            h = step(t, h)
    else:
        h = jax.lax.fori_loop(0, T, step, h0, unroll=8)

    # ---- Final FC: logits (O, TB) = W_fc @ h + b_fc (lane-dense output). ----
    out_ref[...] = (
        jnp.dot(wfc_ref[...], h, preferred_element_type=jnp.float32) + bfc_ref[...]
    ).astype(out_ref.dtype)


def rnn_classifier(x, w_ih, w_hh, b_ih, b_hh, w_fc, b_fc, *, batch_tile=None):
    """x: (B, T, INPUT_SIZE) float32 (batch_first, like nn.RNN(batch_first=True)).
    Weights in PyTorch convention: w_ih (H, I), w_hh (H, H), b_ih (H,), b_hh (H,),
    w_fc (O, H), b_fc (O,)."""
    B, T, I = x.shape
    H = w_ih.shape[0]
    O = w_fc.shape[0]

    # Batch tile in lanes: multiple of 128, as large as possible (<=512), but keep
    # >= 2 tiles for larger batches so megacore (v7x, 2 TCs) can shard the grid.
    if batch_tile is None:
        b128 = _round_up(max(B, 1), 128)
        if b128 <= 128:
            batch_tile = 128
        else:
            batch_tile = min(512, _round_up(b128 // 2, 128))
    TB = batch_tile
    assert TB % 128 == 0
    B_pad = _round_up(B, TB)
    if B_pad != B:
        x = jnp.pad(x, ((0, B_pad - B), (0, 0), (0, 0)))

    # Layout plumbing (outside the kernel): time-major, batch-in-lanes.
    x_tib = jnp.transpose(x, (1, 2, 0))          # (T, I, B_pad)
    b_rnn = (b_ih + b_hh).reshape(H, 1)          # fold both RNN biases (column vec)
    b_fc2 = b_fc.reshape(O, 1)

    n_btiles = B_pad // TB
    # VMEM per tile ~ (2 x-blocks dbl-buffered + xproj scratch)
    #             ~ (2*8 + 16) * T * TB * 4 B  (I pads to 8 sublanes, H to 16) -> tiny
    #               for realistic T; fits the v7x 32 MiB scoped default easily.
    # TODO(synk): for very long sequences add a T grid axis ("arbitrary") carrying h in
    #             a VMEM scratch instead of keeping all T timesteps resident per tile.
    grid_spec = pltpu.PrefetchScalarGridSpec(
        num_scalar_prefetch=0,
        grid=(n_btiles,),
        in_specs=[
            pl.BlockSpec((T, I, TB), lambda i: (0, 0, i)),   # batch tile of x
            pl.BlockSpec((H, I), lambda i: (0, 0)),
            pl.BlockSpec((H, H), lambda i: (0, 0)),
            pl.BlockSpec((H, 1), lambda i: (0, 0)),
            pl.BlockSpec((O, H), lambda i: (0, 0)),
            pl.BlockSpec((O, 1), lambda i: (0, 0)),
        ],
        out_specs=pl.BlockSpec((O, TB), lambda i: (0, i)),
        scratch_shapes=[pltpu.VMEM((T, H, TB), jnp.float32)],
    )

    out = pl.pallas_call(
        rnn_classifier_kernel,
        out_shape=jax.ShapeDtypeStruct((O, B_pad), jnp.float32),
        grid_spec=grid_spec,
        compiler_params=pltpu.CompilerParams(
            dimension_semantics=("parallel",)),
    )(x_tib, w_ih, w_hh, b_rnn, w_fc, b_fc2)

    return jnp.transpose(out[:, :B])             # (B, O)


if __name__ == "__main__":
    key = jax.random.PRNGKey(0)
    ks = jax.random.split(key, 8)

    B, T = 2, 8
    x = jax.random.normal(ks[0], (B, T, INPUT_SIZE), dtype=jnp.float32)

    # Deterministic parameter init (uniform(-1/sqrt(H), 1/sqrt(H)), PyTorch-default shapes).
    bound = 1.0 / (HIDDEN_SIZE ** 0.5)

    def u(k, shape):
        return jax.random.uniform(k, shape, jnp.float32, -bound, bound)

    w_ih = u(ks[1], (HIDDEN_SIZE, INPUT_SIZE))
    w_hh = u(ks[2], (HIDDEN_SIZE, HIDDEN_SIZE))
    b_ih = u(ks[3], (HIDDEN_SIZE,))
    b_hh = u(ks[4], (HIDDEN_SIZE,))
    w_fc = u(ks[5], (OUTPUT_SIZE, HIDDEN_SIZE))
    b_fc = u(ks[6], (OUTPUT_SIZE,))

    out = rnn_classifier(x, w_ih, w_hh, b_ih, b_hh, w_fc, b_fc)
    out = jax.block_until_ready(out)

    # Pure-JAX reference of the exact PyTorch forward pass.
    h = jnp.zeros((B, HIDDEN_SIZE), jnp.float32)
    for t in range(T):
        h = jnp.tanh(x[:, t, :] @ w_ih.T + b_ih + h @ w_hh.T + b_hh)
    ref = h @ w_fc.T + b_fc

    assert out.shape == (B, OUTPUT_SIZE)
    assert jnp.allclose(out, ref, atol=1e-5, rtol=1e-5), (out, ref)
    print("KERNEL_OK")
</pallas_src>

<mosaic_0001>
module attributes {stable_mosaic.version = 11 : i64} {
  func.func @rnn_classifier_kernel(%arg0: i32, %arg1: memref<8x4x128xf32, #tpu.memory_space<vmem>>, %arg2: memref<10x4xf32, #tpu.memory_space<vmem>>, %arg3: memref<10x10xf32, #tpu.memory_space<vmem>>, %arg4: memref<10x1xf32, #tpu.memory_space<vmem>>, %arg5: memref<3x10xf32, #tpu.memory_space<vmem>>, %arg6: memref<3x1xf32, #tpu.memory_space<vmem>>, %arg7: memref<3x128xf32, #tpu.memory_space<vmem>>, %arg8: memref<8x10x128xf32, #tpu.memory_space<vmem>>) attributes {dimension_semantics = [#tpu.dimension_semantics<parallel>], iteration_bounds = array<i64: 1>, scalar_prefetch = 0 : i64, scratch_operands = 1 : i64, tpu.core_type = #tpu.core_type<tc>, window_params = [{transform_indices = @transform_0, window_bounds = array<i64: 8, 4, 128>}, {pipeline_mode = #tpu.pipeline_mode<synchronous>, transform_indices = @transform_1, window_bounds = array<i64: 10, 4>}, {pipeline_mode = #tpu.pipeline_mode<synchronous>, transform_indices = @transform_2, window_bounds = array<i64: 10, 10>}, {pipeline_mode = #tpu.pipeline_mode<synchronous>, transform_indices = @transform_3, window_bounds = array<i64: 10, 1>}, {pipeline_mode = #tpu.pipeline_mode<synchronous>, transform_indices = @transform_4, window_bounds = array<i64: 3, 10>}, {pipeline_mode = #tpu.pipeline_mode<synchronous>, transform_indices = @transform_5, window_bounds = array<i64: 3, 1>}, {transform_indices = @transform_6, window_bounds = array<i64: 3, 128>}]} {
    %c0 = arith.constant 0 : index
    %c0_0 = arith.constant 0 : index
    %0 = vector.load %arg2[%c0, %c0_0] : memref<10x4xf32, #tpu.memory_space<vmem>>, vector<10x4xf32>
    %c0_1 = arith.constant 0 : index
    %c0_2 = arith.constant 0 : index
    %1 = vector.load %arg3[%c0_1, %c0_2] : memref<10x10xf32, #tpu.memory_space<vmem>>, vector<10x10xf32>
    %c0_3 = arith.constant 0 : index
    %c0_4 = arith.constant 0 : index
    %2 = vector.load %arg4[%c0_3, %c0_4] : memref<10x1xf32, #tpu.memory_space<vmem>>, vector<10x1xf32>
    %c0_5 = arith.constant 0 : index
    %c0_6 = arith.constant 0 : index
    %c0_7 = arith.constant 0 : index
    %3 = vector.load %arg1[%c0_5, %c0_6, %c0_7] : memref<8x4x128xf32, #tpu.memory_space<vmem>>, vector<1x4x128xf32>
    %4 = vector.shape_cast %3 : vector<1x4x128xf32> to vector<4x128xf32>
    %cst = arith.constant dense<0.000000e+00> : vector<10x128xf32>
    %5 = tpu.matmul %0, %4, %cst {dimension_numbers = #tpu.dot_dimension_numbers<[1], [0], [0], [1], [0, 0, 1, 1], [], []>} : vector<10x4xf32>, vector<4x128xf32>, vector<10x128xf32> -> vector<10x128xf32>
    %6 = vector.broadcast %2 : vector<10x1xf32> to vector<10x128xf32>
    %7 = arith.addf %5, %6 : vector<10x128xf32>
    %c0_8 = arith.constant 0 : index
    %c0_9 = arith.constant 0 : index
    %c0_10 = arith.constant 0 : index
    %8 = vector.load %arg8[%c0_8, %c0_9, %c0_10] : memref<8x10x128xf32, #tpu.memory_space<vmem>>, vector<1x10x128xf32>
    %9 = vector.shape_cast %8 : vector<1x10x128xf32> to vector<10x128xf32>
    %10 = vector.shape_cast %7 : vector<10x128xf32> to vector<1x10x128xf32>
    tpu.vector_store %arg8[%c0_8, %c0_9, %c0_10], %10 {strides = array<i32>} : memref<8x10x128xf32, #tpu.memory_space<vmem>>, vector<1x10x128xf32>,
    %c1 = arith.constant 1 : index
    %c0_11 = arith.constant 0 : index
    %c0_12 = arith.constant 0 : index
    %11 = vector.load %arg1[%c1, %c0_11, %c0_12] : memref<8x4x128xf32, #tpu.memory_space<vmem>>, vector<1x4x128xf32>
    %12 = vector.shape_cast %11 : vector<1x4x128xf32> to vector<4x128xf32>
    %cst_13 = arith.constant dense<0.000000e+00> : vector<10x128xf32>
    %13 = tpu.matmul %0, %12, %cst_13 {dimension_numbers = #tpu.dot_dimension_numbers<[1], [0], [0], [1], [0, 0, 1, 1], [], []>} : vector<10x4xf32>, vector<4x128xf32>, vector<10x128xf32> -> vector<10x128xf32>
    %14 = vector.broadcast %2 : vector<10x1xf32> to vector<10x128xf32>
    %15 = arith.addf %13, %14 : vector<10x128xf32>
    %c1_14 = arith.constant 1 : index
    %c0_15 = arith.constant 0 : index
    %c0_16 = arith.constant 0 : index
    %16 = vector.load %arg8[%c1_14, %c0_15, %c0_16] : memref<8x10x128xf32, #tpu.memory_space<vmem>>, vector<1x10x128xf32>
    %17 = vector.shape_cast %16 : vector<1x10x128xf32> to vector<10x128xf32>
    %18 = vector.shape_cast %15 : vector<10x128xf32> to vector<1x10x128xf32>
    tpu.vector_store %arg8[%c1_14, %c0_15, %c0_16], %18 {strides = array<i32>} : memref<8x10x128xf32, #tpu.memory_space<vmem>>, vector<1x10x128xf32>,
    %c2 = arith.constant 2 : index
    %c0_17 = arith.constant 0 : index
    %c0_18 = arith.constant 0 : index
    %19 = vector.load %arg1[%c2, %c0_17, %c0_18] : memref<8x4x128xf32, #tpu.memory_space<vmem>>, vector<1x4x128xf32>
    %20 = vector.shape_cast %19 : vector<1x4x128xf32> to vector<4x128xf32>
    %cst_19 = arith.constant dense<0.000000e+00> : vector<10x128xf32>
    %21 = tpu.matmul %0, %20, %cst_19 {dimension_numbers = #tpu.dot_dimension_numbers<[1], [0], [0], [1], [0, 0, 1, 1], [], []>} : vector<10x4xf32>, vector<4x128xf32>, vector<10x128xf32> -> vector<10x128xf32>
    %22 = vector.broadcast %2 : vector<10x1xf32> to vector<10x128xf32>
    %23 = arith.addf %21, %22 : vector<10x128xf32>
    %c2_20 = arith.constant 2 : index
    %c0_21 = arith.constant 0 : index
    %c0_22 = arith.constant 0 : index
    %24 = vector.load %arg8[%c2_20, %c0_21, %c0_22] : memref<8x10x128xf32, #tpu.memory_space<vmem>>, vector<1x10x128xf32>
    %25 = vector.shape_cast %24 : vector<1x10x128xf32> to vector<10x128xf32>
    %26 = vector.shape_cast %23 : vector<10x128xf32> to vector<1x10x128xf32>
    tpu.vector_store %arg8[%c2_20, %c0_21, %c0_22], %26 {strides = array<i32>} : memref<8x10x128xf32, #tpu.memory_space<vmem>>, vector<1x10x128xf32>,
    %c3 = arith.constant 3 : index
    %c0_23 = arith.constant 0 : index
    %c0_24 = arith.constant 0 : index
    %27 = vector.load %arg1[%c3, %c0_23, %c0_24] : memref<8x4x128xf32, #tpu.memory_space<vmem>>, vector<1x4x128xf32>
    %28 = vector.shape_cast %27 : vector<1x4x128xf32> to vector<4x128xf32>
    %cst_25 = arith.constant dense<0.000000e+00> : vector<10x128xf32>
    %29 = tpu.matmul %0, %28, %cst_25 {dimension_numbers = #tpu.dot_dimension_numbers<[1], [0], [0], [1], [0, 0, 1, 1], [], []>} : vector<10x4xf32>, vector<4x128xf32>, vector<10x128xf32> -> vector<10x128xf32>
    %30 = vector.broadcast %2 : vector<10x1xf32> to vector<10x128xf32>
    %31 = arith.addf %29, %30 : vector<10x128xf32>
    %c3_26 = arith.constant 3 : index
    %c0_27 = arith.constant 0 : index
    %c0_28 = arith.constant 0 : index
    %32 = vector.load %arg8[%c3_26, %c0_27, %c0_28] : memref<8x10x128xf32, #tpu.memory_space<vmem>>, vector<1x10x128xf32>
    %33 = vector.shape_cast %32 : vector<1x10x128xf32> to vector<10x128xf32>
    %34 = vector.shape_cast %31 : vector<10x128xf32> to vector<1x10x128xf32>
    tpu.vector_store %arg8[%c3_26, %c0_27, %c0_28], %34 {strides = array<i32>} : memref<8x10x128xf32, #tpu.memory_space<vmem>>, vector<1x10x128xf32>,
    %c4 = arith.constant 4 : index
    %c0_29 = arith.constant 0 : index
    %c0_30 = arith.constant 0 : index
    %35 = vector.load %arg1[%c4, %c0_29, %c0_30] : memref<8x4x128xf32, #tpu.memory_space<vmem>>, vector<1x4x128xf32>
    %36 = vector.shape_cast %35 : vector<1x4x128xf32> to vector<4x128xf32>
    %cst_31 = arith.constant dense<0.000000e+00> : vector<10x128xf32>
    %37 = tpu.matmul %0, %36, %cst_31 {dimension_numbers = #tpu.dot_dimension_numbers<[1], [0], [0], [1], [0, 0, 1, 1], [], []>} : vector<10x4xf32>, vector<4x128xf32>, vector<10x128xf32> -> vector<10x128xf32>
    %38 = vector.broadcast %2 : vector<10x1xf32> to vector<10x128xf32>
    %39 = arith.addf %37, %38 : vector<10x128xf32>
    %c4_32 = arith.constant 4 : index
    %c0_33 = arith.constant 0 : index
    %c0_34 = arith.constant 0 : index
    %40 = vector.load %arg8[%c4_32, %c0_33, %c0_34] : memref<8x10x128xf32, #tpu.memory_space<vmem>>, vector<1x10x128xf32>
    %41 = vector.shape_cast %40 : vector<1x10x128xf32> to vector<10x128xf32>
    %42 = vector.shape_cast %39 : vector<10x128xf32> to vector<1x10x128xf32>
    tpu.vector_store %arg8[%c4_32, %c0_33, %c0_34], %42 {strides = array<i32>} : memref<8x10x128xf32, #tpu.memory_space<vmem>>, vector<1x10x128xf32>,
    %c5 = arith.constant 5 : index
    %c0_35 = arith.constant 0 : index
    %c0_36 = arith.constant 0 : index
    %43 = vector.load %arg1[%c5, %c0_35, %c0_36] : memref<8x4x128xf32, #tpu.memory_space<vmem>>, vector<1x4x128xf32>
    %44 = vector.shape_cast %43 : vector<1x4x128xf32> to vector<4x128xf32>
    %cst_37 = arith.constant dense<0.000000e+00> : vector<10x128xf32>
    %45 = tpu.matmul %0, %44, %cst_37 {dimension_numbers = #tpu.dot_dimension_numbers<[1], [0], [0], [1], [0, 0, 1, 1], [], []>} : vector<10x4xf32>, vector<4x128xf32>, vector<10x128xf32> -> vector<10x128xf32>
    %46 = vector.broadcast %2 : vector<10x1xf32> to vector<10x128xf32>
    %47 = arith.addf %45, %46 : vector<10x128xf32>
    %c5_38 = arith.constant 5 : index
    %c0_39 = arith.constant 0 : index
    %c0_40 = arith.constant 0 : index
    %48 = vector.load %arg8[%c5_38, %c0_39, %c0_40] : memref<8x10x128xf32, #tpu.memory_space<vmem>>, vector<1x10x128xf32>
    %49 = vector.shape_cast %48 : vector<1x10x128xf32> to vector<10x128xf32>
    %50 = vector.shape_cast %47 : vector<10x128xf32> to vector<1x10x128xf32>
    tpu.vector_store %arg8[%c5_38, %c0_39, %c0_40], %50 {strides = array<i32>} : memref<8x10x128xf32, #tpu.memory_space<vmem>>, vector<1x10x128xf32>,
    %c6 = arith.constant 6 : index
    %c0_41 = arith.constant 0 : index
    %c0_42 = arith.constant 0 : index
    %51 = vector.load %arg1[%c6, %c0_41, %c0_42] : memref<8x4x128xf32, #tpu.memory_space<vmem>>, vector<1x4x128xf32>
    %52 = vector.shape_cast %51 : vector<1x4x128xf32> to vector<4x128xf32>
    %cst_43 = arith.constant dense<0.000000e+00> : vector<10x128xf32>
    %53 = tpu.matmul %0, %52, %cst_43 {dimension_numbers = #tpu.dot_dimension_numbers<[1], [0], [0], [1], [0, 0, 1, 1], [], []>} : vector<10x4xf32>, vector<4x128xf32>, vector<10x128xf32> -> vector<10x128xf32>
    %54 = vector.broadcast %2 : vector<10x1xf32> to vector<10x128xf32>
    %55 = arith.addf %53, %54 : vector<10x128xf32>
    %c6_44 = arith.constant 6 : index
    %c0_45 = arith.constant 0 : index
    %c0_46 = arith.constant 0 : index
    %56 = vector.load %arg8[%c6_44, %c0_45, %c0_46] : memref<8x10x128xf32, #tpu.memory_space<vmem>>, vector<1x10x128xf32>
    %57 = vector.shape_cast %56 : vector<1x10x128xf32> to vector<10x128xf32>
    %58 = vector.shape_cast %55 : vector<10x128xf32> to vector<1x10x128xf32>
    tpu.vector_store %arg8[%c6_44, %c0_45, %c0_46], %58 {strides = array<i32>} : memref<8x10x128xf32, #tpu.memory_space<vmem>>, vector<1x10x128xf32>,
    %c7 = arith.constant 7 : index
    %c0_47 = arith.constant 0 : index
    %c0_48 = arith.constant 0 : index
    %59 = vector.load %arg1[%c7, %c0_47, %c0_48] : memref<8x4x128xf32, #tpu.memory_space<vmem>>, vector<1x4x128xf32>
    %60 = vector.shape_cast %59 : vector<1x4x128xf32> to vector<4x128xf32>
    %cst_49 = arith.constant dense<0.000000e+00> : vector<10x128xf32>
    %61 = tpu.matmul %0, %60, %cst_49 {dimension_numbers = #tpu.dot_dimension_numbers<[1], [0], [0], [1], [0, 0, 1, 1], [], []>} : vector<10x4xf32>, vector<4x128xf32>, vector<10x128xf32> -> vector<10x128xf32>
    %62 = vector.broadcast %2 : vector<10x1xf32> to vector<10x128xf32>
    %63 = arith.addf %61, %62 : vector<10x128xf32>
    %c7_50 = arith.constant 7 : index
    %c0_51 = arith.constant 0 : index
    %c0_52 = arith.constant 0 : index
    %64 = vector.load %arg8[%c7_50, %c0_51, %c0_52] : memref<8x10x128xf32, #tpu.memory_space<vmem>>, vector<1x10x128xf32>
    %65 = vector.shape_cast %64 : vector<1x10x128xf32> to vector<10x128xf32>
    %66 = vector.shape_cast %63 : vector<10x128xf32> to vector<1x10x128xf32>
    tpu.vector_store %arg8[%c7_50, %c0_51, %c0_52], %66 {strides = array<i32>} : memref<8x10x128xf32, #tpu.memory_space<vmem>>, vector<1x10x128xf32>,
    %cst_53 = arith.constant 0.000000e+00 : f32
    %67 = vector.broadcast %cst_53 : f32 to vector<10x128xf32>
    %c0_54 = arith.constant 0 : index
    %c0_55 = arith.constant 0 : index
    %c0_56 = arith.constant 0 : index
    %68 = vector.load %arg8[%c0_54, %c0_55, %c0_56] : memref<8x10x128xf32, #tpu.memory_space<vmem>>, vector<1x10x128xf32>
    %69 = vector.shape_cast %68 : vector<1x10x128xf32> to vector<10x128xf32>
    %cst_57 = arith.constant dense<0.000000e+00> : vector<10x128xf32>
    %70 = tpu.matmul %1, %67, %cst_57 {dimension_numbers = #tpu.dot_dimension_numbers<[1], [0], [0], [1], [0, 0, 1, 1], [], []>} : vector<10x10xf32>, vector<10x128xf32>, vector<10x128xf32> -> vector<10x128xf32>
    %71 = arith.addf %69, %70 : vector<10x128xf32>
    %72 = math.tanh %71 : vector<10x128xf32>
    %c1_58 = arith.constant 1 : index
    %c0_59 = arith.constant 0 : index
    %c0_60 = arith.constant 0 : index
    %73 = vector.load %arg8[%c1_58, %c0_59, %c0_60] : memref<8x10x128xf32, #tpu.memory_space<vmem>>, vector<1x10x128xf32>
    %74 = vector.shape_cast %73 : vector<1x10x128xf32> to vector<10x128xf32>
    %cst_61 = arith.constant dense<0.000000e+00> : vector<10x128xf32>
    %75 = tpu.matmul %1, %72, %cst_61 {dimension_numbers = #tpu.dot_dimension_numbers<[1], [0], [0], [1], [0, 0, 1, 1], [], []>} : vector<10x10xf32>, vector<10x128xf32>, vector<10x128xf32> -> vector<10x128xf32>
    %76 = arith.addf %74, %75 : vector<10x128xf32>
    %77 = math.tanh %76 : vector<10x128xf32>
    %c2_62 = arith.constant 2 : index
    %c0_63 = arith.constant 0 : index
    %c0_64 = arith.constant 0 : index
    %78 = vector.load %arg8[%c2_62, %c0_63, %c0_64] : memref<8x10x128xf32, #tpu.memory_space<vmem>>, vector<1x10x128xf32>
    %79 = vector.shape_cast %78 : vector<1x10x128xf32> to vector<10x128xf32>
    %cst_65 = arith.constant dense<0.000000e+00> : vector<10x128xf32>
    %80 = tpu.matmul %1, %77, %cst_65 {dimension_numbers = #tpu.dot_dimension_numbers<[1], [0], [0], [1], [0, 0, 1, 1], [], []>} : vector<10x10xf32>, vector<10x128xf32>, vector<10x128xf32> -> vector<10x128xf32>
    %81 = arith.addf %79, %80 : vector<10x128xf32>
    %82 = math.tanh %81 : vector<10x128xf32>
    %c3_66 = arith.constant 3 : index
    %c0_67 = arith.constant 0 : index
    %c0_68 = arith.constant 0 : index
    %83 = vector.load %arg8[%c3_66, %c0_67, %c0_68] : memref<8x10x128xf32, #tpu.memory_space<vmem>>, vector<1x10x128xf32>
    %84 = vector.shape_cast %83 : vector<1x10x128xf32> to vector<10x128xf32>
    %cst_69 = arith.constant dense<0.000000e+00> : vector<10x128xf32>
    %85 = tpu.matmul %1, %82, %cst_69 {dimension_numbers = #tpu.dot_dimension_numbers<[1], [0], [0], [1], [0, 0, 1, 1], [], []>} : vector<10x10xf32>, vector<10x128xf32>, vector<10x128xf32> -> vector<10x128xf32>
    %86 = arith.addf %84, %85 : vector<10x128xf32>
    %87 = math.tanh %86 : vector<10x128xf32>
    %c4_70 = arith.constant 4 : index
    %c0_71 = arith.constant 0 : index
    %c0_72 = arith.constant 0 : index
    %88 = vector.load %arg8[%c4_70, %c0_71, %c0_72] : memref<8x10x128xf32, #tpu.memory_space<vmem>>, vector<1x10x128xf32>
    %89 = vector.shape_cast %88 : vector<1x10x128xf32> to vector<10x128xf32>
    %cst_73 = arith.constant dense<0.000000e+00> : vector<10x128xf32>
    %90 = tpu.matmul %1, %87, %cst_73 {dimension_numbers = #tpu.dot_dimension_numbers<[1], [0], [0], [1], [0, 0, 1, 1], [], []>} : vector<10x10xf32>, vector<10x128xf32>, vector<10x128xf32> -> vector<10x128xf32>
    %91 = arith.addf %89, %90 : vector<10x128xf32>
    %92 = math.tanh %91 : vector<10x128xf32>
    %c5_74 = arith.constant 5 : index
    %c0_75 = arith.constant 0 : index
    %c0_76 = arith.constant 0 : index
    %93 = vector.load %arg8[%c5_74, %c0_75, %c0_76] : memref<8x10x128xf32, #tpu.memory_space<vmem>>, vector<1x10x128xf32>
    %94 = vector.shape_cast %93 : vector<1x10x128xf32> to vector<10x128xf32>
    %cst_77 = arith.constant dense<0.000000e+00> : vector<10x128xf32>
    %95 = tpu.matmul %1, %92, %cst_77 {dimension_numbers = #tpu.dot_dimension_numbers<[1], [0], [0], [1], [0, 0, 1, 1], [], []>} : vector<10x10xf32>, vector<10x128xf32>, vector<10x128xf32> -> vector<10x128xf32>
    %96 = arith.addf %94, %95 : vector<10x128xf32>
    %97 = math.tanh %96 : vector<10x128xf32>
    %c6_78 = arith.constant 6 : index
    %c0_79 = arith.constant 0 : index
    %c0_80 = arith.constant 0 : index
    %98 = vector.load %arg8[%c6_78, %c0_79, %c0_80] : memref<8x10x128xf32, #tpu.memory_space<vmem>>, vector<1x10x128xf32>
    %99 = vector.shape_cast %98 : vector<1x10x128xf32> to vector<10x128xf32>
    %cst_81 = arith.constant dense<0.000000e+00> : vector<10x128xf32>
    %100 = tpu.matmul %1, %97, %cst_81 {dimension_numbers = #tpu.dot_dimension_numbers<[1], [0], [0], [1], [0, 0, 1, 1], [], []>} : vector<10x10xf32>, vector<10x128xf32>, vector<10x128xf32> -> vector<10x128xf32>
    %101 = arith.addf %99, %100 : vector<10x128xf32>
    %102 = math.tanh %101 : vector<10x128xf32>
    %c7_82 = arith.constant 7 : index
    %c0_83 = arith.constant 0 : index
    %c0_84 = arith.constant 0 : index
    %103 = vector.load %arg8[%c7_82, %c0_83, %c0_84] : memref<8x10x128xf32, #tpu.memory_space<vmem>>, vector<1x10x128xf32>
    %104 = vector.shape_cast %103 : vector<1x10x128xf32> to vector<10x128xf32>
    %cst_85 = arith.constant dense<0.000000e+00> : vector<10x128xf32>
    %105 = tpu.matmul %1, %102, %cst_85 {dimension_numbers = #tpu.dot_dimension_numbers<[1], [0], [0], [1], [0, 0, 1, 1], [], []>} : vector<10x10xf32>, vector<10x128xf32>, vector<10x128xf32> -> vector<10x128xf32>
    %106 = arith.addf %104, %105 : vector<10x128xf32>
    %107 = math.tanh %106 : vector<10x128xf32>
    %c0_86 = arith.constant 0 : index
    %c0_87 = arith.constant 0 : index
    %108 = vector.load %arg5[%c0_86, %c0_87] : memref<3x10xf32, #tpu.memory_space<vmem>>, vector<3x10xf32>
    %cst_88 = arith.constant dense<0.000000e+00> : vector<3x128xf32>
    %109 = tpu.matmul %108, %107, %cst_88 {dimension_numbers = #tpu.dot_dimension_numbers<[1], [0], [0], [1], [0, 0, 1, 1], [], []>} : vector<3x10xf32>, vector<10x128xf32>, vector<3x128xf32> -> vector<3x128xf32>
    %c0_89 = arith.constant 0 : index
    %c0_90 = arith.constant 0 : index
    %110 = vector.load %arg6[%c0_89, %c0_90] : memref<3x1xf32, #tpu.memory_space<vmem>>, vector<3x1xf32>
    %111 = vector.broadcast %110 : vector<3x1xf32> to vector<3x128xf32>
    %112 = arith.addf %109, %111 : vector<3x128xf32>
    %c0_91 = arith.constant 0 : index
    %c0_92 = arith.constant 0 : index
    %113 = vector.load %arg7[%c0_91, %c0_92] : memref<3x128xf32, #tpu.memory_space<vmem>>, vector<3x128xf32>
    tpu.vector_store %arg7[%c0_91, %c0_92], %112 {strides = array<i32>} : memref<3x128xf32, #tpu.memory_space<vmem>>, vector<3x128xf32>,
    return
  }
  func.func @transform_0(%arg0: i32) -> (i32, i32, i32) {
    %c0_i32 = arith.constant 0 : i32
    %c0_i32_0 = arith.constant 0 : i32
    %c0_i32_1 = arith.constant 0 : i32
    return %c0_i32, %c0_i32_0, %arg0 : i32, i32, i32
  }
  func.func @transform_1(%arg0: i32) -> (i32, i32) {
    %c0_i32 = arith.constant 0 : i32
    %c0_i32_0 = arith.constant 0 : i32
    %c0_i32_1 = arith.constant 0 : i32
    return %c0_i32, %c0_i32_0 : i32, i32
  }
  func.func @transform_2(%arg0: i32) -> (i32, i32) {
    %c0_i32 = arith.constant 0 : i32
    %c0_i32_0 = arith.constant 0 : i32
    %c0_i32_1 = arith.constant 0 : i32
    return %c0_i32, %c0_i32_0 : i32, i32
  }
  func.func @transform_3(%arg0: i32) -> (i32, i32) {
    %c0_i32 = arith.constant 0 : i32
    %c0_i32_0 = arith.constant 0 : i32
    %c0_i32_1 = arith.constant 0 : i32
    return %c0_i32, %c0_i32_0 : i32, i32
  }
  func.func @transform_4(%arg0: i32) -> (i32, i32) {
    %c0_i32 = arith.constant 0 : i32
    %c0_i32_0 = arith.constant 0 : i32
    %c0_i32_1 = arith.constant 0 : i32
    return %c0_i32, %c0_i32_0 : i32, i32
  }
  func.func @transform_5(%arg0: i32) -> (i32, i32) {
    %c0_i32 = arith.constant 0 : i32
    %c0_i32_0 = arith.constant 0 : i32
    %c0_i32_1 = arith.constant 0 : i32
    return %c0_i32, %c0_i32_0 : i32, i32
  }
  func.func @transform_6(%arg0: i32) -> (i32, i32) {
    %c0_i32 = arith.constant 0 : i32
    %c0_i32_0 = arith.constant 0 : i32
    return %c0_i32, %arg0 : i32, i32
  }
}

</mosaic_0001>

<bundles_post_ra>
// kernel: tpu_custom_call.1
= control target key start
LH: loop header
LB: loop body
LE: loop exit
PB: predicated region body
PF: predicated region fallthrough
CT: control target
= control target key end

     0   :  { %11 = vsyncpa [#allocation4], 0  ;;  %s949_s0 = inlined_call_operand.vmem [shape: f32[8,4,128], index: 0, kind: input, shape index: {}]   ;;  %s950_s1 = inlined_call_operand.vmem [shape: f32[10,4], index: 1, kind: input, shape index: {}]   ;;  %s951_s2 = inlined_call_operand.hbm [shape: f32[10,10], index: 2, kind: input, shape index: {}]   ;;  %s952_s3 = inlined_call_operand.vmem [shape: f32[10,1], index: 3, kind: input, shape index: {}]   ;;  %s953_s4 = inlined_call_operand.vmem [shape: f32[3,10], index: 4, kind: input, shape index: {}]   ;;  %s954_s5 = inlined_call_operand.vmem [shape: f32[3,1], index: 5, kind: input, shape index: {}]   ;;  %s955_s6 = inlined_call_operand.hbm [shape: f32[3,128], index: 6, kind: output, shape index: {}]  }
   0x1   :  { %12 = vsyncpa [#allocation5], 0  ;;  %s21_s23 = sshll.u32 %s951_s2, 4  ;;  %s773_s24 = smov [#allocation3]   ;;  %s22_s23 = int_to_ptr.hbm [resolvable:$true] %s21_s23 }
   0x2   :  { %s23_s25 = sshll.u32 %s773_s24, 4  ;;  %s774_s26 = smov 128   ;;  %s24_s25 = int_to_ptr.vmem [resolvable:$true] %s23_s25 }
   0x3   :  { %s775_s27 = smov 8  }
   0x4   :  { %29 = dma.hbm_to_vmem [thread:$0]  %s22_s23, 256, %s24_s25, [#allocation4], %s774_s26, %s774_s26, %s775_s27  }
   0x5   :  { %769 = dma.done.wait [#allocation4], 256  }
   0x6   :  { %770 = vsyncadd [#allocation4], 4294967040  ;;  %v776_v0 = vmov 0   ;;  %vm64_vm0 = vcmask 1043456   ;;  %vm57_vm1 = vcmask 31744   ;;  %v40_v5 = vld [vmem:[%s950_s1] sm:$0xff] }
   0x7   :  { %687 = vset.pattern.permute.xlu0 %v776_v0  ;;  %688 = vset.pattern.permute.xlu1 %v776_v0  ;;  %v46_v1 = vld [vmem:[%s949_s0] sm:$0xf]  ;;  %v628_v2 = vld [vmem:[%s949_s0 + $0x4] sm:$0xf]  ;;  %v632_v3 = vld [vmem:[%s949_s0 + $0x8] sm:$0xf] }
   0x8   :  { %625 = vmatpush.msk.msra.mxu0 %vm64_vm0, %v46_v1  ;;  %629 = vmatpush.msk.msra.mxu1 %vm64_vm0, %v628_v2  ;;  %v636_v4 = vld [vmem:[%s949_s0 + $0xc] sm:$0xf]  ;;  %v45_v6 = vld [vmem:[%s952_s3 + $0x8] sm:$0x3]  ;;  %v640_v7 = vld [vmem:[%s949_s0 + $0x10] sm:$0xf] }
   0x9   :  { %633 = vmatpush.msk.msra.mxu2 %vm64_vm0, %v632_v3  ;;  %637 = vmatpush.msk.msra.mxu3 %vm64_vm0, %v636_v4  ;;  %v644_v8 = vld [vmem:[%s949_s0 + $0x14] sm:$0xf]  ;;  %v648_v9 = vld [vmem:[%s949_s0 + $0x18] sm:$0xf]  ;;  %v652_v10 = vld [vmem:[%s949_s0 + $0x1c] sm:$0xf] }
   0xa   :  { %626 = vmatmul.msk.f32.vlgmr.msra.gmra.mxu0 %vm57_vm1, %v40_v5  ;;  %630 = vmatmul.msk.f32.vlgmr.msra.gmra.mxu1 %vm57_vm1, %v40_v5  ;;  %v777_v11 = vmov 0.0   ;;  %v41_v12 = vld [vmem:[%s950_s1 + $0x8] sm:$0x3]  ;;  %v44_v13 = vld [vmem:[%s952_s3] sm:$0xff]  ;;  %vm312_vm2 = vcmask 80896   ;;  %vm319_vm3 = vcmask 1041408  }
   0xb   :  { %634 = vmatmul.msk.f32.vlgmr.msra.gmra.mxu2 %vm57_vm1, %v40_v5  ;;  %638 = vmatmul.msk.f32.vlgmr.msra.gmra.mxu3 %vm57_vm1, %v40_v5  ;;  %v877_v14 = vld [vmem:[#allocation3] sm:$0xff]  ;;  %v881_v15 = vld [vmem:[#allocation3 + $0x8] sm:$0x3]  ;;  %s615_s2 = sshll.u32 %s955_s6, 4  ;;  %s616_s2 = int_to_ptr.hbm [resolvable:$true] %s615_s2 }
   0xc   :  { %54 = vperm.xlu0 %687, %v45_v6   ;;  %641 = vmatpush.msk.msrb.mxu0 %vm64_vm0, %v640_v7 }
   0xd   :  { %645 = vmatpush.msk.msrb.mxu1 %vm64_vm0, %v644_v8  ;;  %649 = vmatpush.msk.msrb.mxu2 %vm64_vm0, %v648_v9 }
   0xe   :  { %653 = vmatpush.msk.msrb.mxu3 %vm64_vm0, %v652_v10  ;;  %338 = vmatpush.msra.mxu0 %v777_v11 }
  0x12   :  { %627 = vmatmul.msk.f32.gmra.mxu0 %vm57_vm1, %v41_v12  ;;  %631 = vmatmul.msk.f32.gmra.mxu1 %vm57_vm1, %v41_v12 }
  0x13   :  { %635 = vmatmul.msk.f32.gmra.mxu2 %vm57_vm1, %v41_v12  ;;  %639 = vmatmul.msk.f32.gmra.mxu3 %vm57_vm1, %v41_v12 }
  0x14   :  { %49 = vperm.xlu0 %687, %v44_v13  }
  0x1a   :  { %642 = vmatmul.msk.f32.vlgmr.msrb.gmra.mxu0 %vm57_vm1, %v40_v5  ;;  %646 = vmatmul.msk.f32.vlgmr.msrb.gmra.mxu1 %vm57_vm1, %v40_v5 }
  0x1b   :  { %650 = vmatmul.msk.f32.vlgmr.msrb.gmra.mxu2 %vm57_vm1, %v40_v5  ;;  %654 = vmatmul.msk.f32.vlgmr.msrb.gmra.mxu3 %vm57_vm1, %v40_v5 }
  0x22   :  { %643 = vmatmul.msk.f32.gmra.mxu0 %vm57_vm1, %v41_v12  ;;  %647 = vmatmul.msk.f32.gmra.mxu1 %vm57_vm1, %v41_v12 }
  0x23   :  { %651 = vmatmul.msk.f32.gmra.mxu2 %vm57_vm1, %v41_v12  ;;  %655 = vmatmul.msk.f32.gmra.mxu3 %vm57_vm1, %v41_v12 }
  0x2a   :  { %656 = vmatmul.msk.f32.vlgmr.msra.gmra.mxu0 %vm312_vm2, %v877_v14 }
  0x32   :  { %657 = vmatmul.msk.f32.gmra.mxu0 %vm312_vm2, %v881_v15 }
  0x7e   :  { %v55_v16 = vpop.permute.xlu0 %54 }
  0x86   :  { %v50_v17 = vpop.permute.xlu0 %49 }
  0x87   :  { %v85_v18 = vpop.f32.mrf.mxu0  ;;  %v115_v19 = vpop.f32.mrf.mxu1 }
  0x88   :  { %v86_v20 = vadd.f32 %v85_v18, %v50_v17  ;;  %v116_v21 = vadd.f32 %v115_v19, %v50_v17 }
  0x8e   :  { %v146_v22 = vpop.f32.mrf.mxu2  ;;  %v177_v23 = vpop.f32.mrf.mxu3 }
  0x8f   :  { %v885_v24 = vadd.f32 %v146_v22, %v50_v17  ;;  %v887_v25 = vadd.f32 %v177_v23, %v50_v17  ;;  %v88_v26 = vpop.f32.mrf.mxu0  ;;  %v118_v27 = vpop.f32.mrf.mxu1 }
  0x90   :  { %v89_v28 = vadd.f32 %v88_v26, %v55_v16  ;;  %v119_v29 = vadd.f32 %v118_v27, %v55_v16 }
  0x92   :  { %92 = vst [vmem:[#allocation2] sm:$0x3] %v89_v28 }
  0x93   :  { %123 = vst [vmem:[#allocation2 + $0x18] sm:$0x3] %v119_v29 }
  0x96   :  { %v149_v30 = vpop.f32.mrf.mxu2  ;;  %v180_v31 = vpop.f32.mrf.mxu3 }
  0x97   :  { %v150_v32 = vadd.f32 %v149_v30, %v55_v16  ;;  %v181_v33 = vadd.f32 %v180_v31, %v55_v16  ;;  %v208_v34 = vpop.f32.mrf.mxu0  ;;  %v239_v35 = vpop.f32.mrf.mxu1 }
  0x98   :  { %v889_v36 = vadd.f32 %v208_v34, %v50_v17  ;;  %v891_v37 = vadd.f32 %v239_v35, %v50_v17 }
  0x99   :  { %154 = vst [vmem:[#allocation2 + $0x68] sm:$0x3] %v150_v32  ;;  %v311_v51 = vld [vmem:[#allocation2] sm:$0x3] }
  0x9a   :  { %185 = vst [vmem:[#allocation2 + $0x48] sm:$0x3] %v181_v33  ;;  %v351_v58 = vld [vmem:[#allocation2 + $0x18] sm:$0x3] }
  0x9e   :  { %v270_v38 = vpop.f32.mrf.mxu2  ;;  %v301_v39 = vpop.f32.mrf.mxu3 }
  0x9f   :  { %v893_v40 = vadd.f32 %v270_v38, %v50_v17  ;;  %v895_v41 = vadd.f32 %v301_v39, %v50_v17  ;;  %v211_v42 = vpop.f32.mrf.mxu0  ;;  %v242_v43 = vpop.f32.mrf.mxu1 }
  0xa0   :  { %v212_v44 = vadd.f32 %v211_v42, %v55_v16  ;;  %v243_v45 = vadd.f32 %v242_v43, %v55_v16  ;;  %v383_v1 = vld [vmem:[#allocation2 + $0x68] sm:$0x3] }
  0xa1   :  { %v415_v8 = vld [vmem:[#allocation2 + $0x48] sm:$0x3] }
  0xa2   :  { %216 = vst [vmem:[#allocation2 + $0x20] sm:$0x3] %v212_v44 }
  0xa3   :  { %247 = vst [vmem:[#allocation2 + $0x38] sm:$0x3] %v243_v45 }
  0xa6   :  { %v273_v46 = vpop.f32.mrf.mxu2  ;;  %v304_v47 = vpop.f32.mrf.mxu3 }
  0xa7   :  { %v274_v48 = vadd.f32 %v273_v46, %v55_v16  ;;  %v305_v49 = vadd.f32 %v304_v47, %v55_v16  ;;  %v340_v50 = vpop.f32.mrf.mxu0 }
  0xa8   :  { %v346_v53 = vadd.f32 %v340_v50, %v86_v20 }
  0xa9   :  { %278 = vst [vmem:[#allocation2 + $0x70] sm:$0x3] %v274_v48  ;;  %v447_v17 = vld [vmem:[#allocation2 + $0x20] sm:$0x3] }
  0xaa   :  { %309 = vst [vmem:[#allocation2 + $0x28] sm:$0x3] %v305_v49 }
  0xaf   :  { %v343_v52 = vpop.f32.mrf.mxu0 }
  0xb0   :  { %v347_v54 = vadd.f32 %v343_v52, %v311_v51  ;;  %v511_v31 = vld [vmem:[#allocation2 + $0x70] sm:$0x3] }
  0xb1   :  { %v543_v39 = vld [vmem:[#allocation2 + $0x28] sm:$0x3] }
  0xb2   :  { %689 = vtanh.f32 %v347_v54 }
  0xb3   :  { %691 = vtanh.f32 %v346_v53 }
  0xb8   :  { %v690_v55 = vpop.eup %689 }
  0xb9   :  { %658 = vmatpush.msk.msra.mxu1 %vm319_vm3, %v690_v55  ;;  %v692_v56 = vpop.eup %691 }
  0xbb   :  { %370 = vmatpush.msra.mxu1 %v692_v56 }
  0xbc   :  { %659 = vmatmul.msk.f32.vlgmr.msra.gmra.mxu1 %vm312_vm2, %v877_v14 }
  0xc4   :  { %660 = vmatmul.msk.f32.gmra.mxu1 %vm312_vm2, %v881_v15 }
 0x139   :  { %v372_v57 = vpop.f32.mrf.mxu1 }
 0x13a   :  { %v378_v60 = vadd.f32 %v372_v57, %v116_v21 }
 0x141   :  { %v375_v59 = vpop.f32.mrf.mxu1 }
 0x142   :  { %v379_v61 = vadd.f32 %v375_v59, %v351_v58 }
 0x144   :  { %693 = vtanh.f32 %v379_v61 }
 0x145   :  { %695 = vtanh.f32 %v378_v60 }
 0x14a   :  { %v694_v62 = vpop.eup %693 }
 0x14b   :  { %661 = vmatpush.msk.msra.mxu2 %vm319_vm3, %v694_v62  ;;  %v696_v63 = vpop.eup %695 }
 0x14d   :  { %402 = vmatpush.msra.mxu2 %v696_v63 }
 0x14e   :  { %662 = vmatmul.msk.f32.vlgmr.msra.gmra.mxu2 %vm312_vm2, %v877_v14 }
 0x156   :  { %663 = vmatmul.msk.f32.gmra.mxu2 %vm312_vm2, %v881_v15 }
 0x1d1   :  { %v404_v0 = vpop.f32.mrf.mxu2 }
 0x1d2   :  { %v410_v3 = vadd.f32 %v404_v0, %v885_v24  ;;  %v479_v24 = vld [vmem:[#allocation2 + $0x38] sm:$0x3] }
 0x1d9   :  { %v407_v2 = vpop.f32.mrf.mxu2 }
 0x1da   :  { %v411_v4 = vadd.f32 %v407_v2, %v383_v1 }
 0x1dc   :  { %697 = vtanh.f32 %v411_v4 }
 0x1dd   :  { %699 = vtanh.f32 %v410_v3 }
 0x1e2   :  { %v698_v5 = vpop.eup %697 }
 0x1e3   :  { %664 = vmatpush.msk.msra.mxu3 %vm319_vm3, %v698_v5  ;;  %v700_v6 = vpop.eup %699 }
 0x1e5   :  { %434 = vmatpush.msra.mxu3 %v700_v6 }
 0x1e6   :  { %665 = vmatmul.msk.f32.vlgmr.msra.gmra.mxu3 %vm312_vm2, %v877_v14 }
 0x1ee   :  { %666 = vmatmul.msk.f32.gmra.mxu3 %vm312_vm2, %v881_v15 }
 0x269   :  { %v436_v7 = vpop.f32.mrf.mxu3 }
 0x26a   :  { %v442_v10 = vadd.f32 %v436_v7, %v887_v25 }
 0x271   :  { %v439_v9 = vpop.f32.mrf.mxu3 }
 0x272   :  { %v443_v11 = vadd.f32 %v439_v9, %v415_v8 }
 0x274   :  { %701 = vtanh.f32 %v443_v11 }
 0x275   :  { %703 = vtanh.f32 %v442_v10 }
 0x27a   :  { %v702_v12 = vpop.eup %701 }
 0x27b   :  { %667 = vmatpush.msk.msrb.mxu0 %vm319_vm3, %v702_v12  ;;  %v704_v13 = vpop.eup %703 }
 0x27d   :  { %466 = vmatpush.msrb.mxu0 %v704_v13 }
 0x27e   :  { %668 = vmatmul.msk.f32.vlgmr.msrb.gmra.mxu0 %vm312_vm2, %v877_v14 }
 0x286   :  { %669 = vmatmul.msk.f32.gmra.mxu0 %vm312_vm2, %v881_v15 }
 0x2fb   :  { %v468_v16 = vpop.f32.mrf.mxu0 }
 0x2fc   :  { %v474_v19 = vadd.f32 %v468_v16, %v889_v36 }
 0x303   :  { %v471_v18 = vpop.f32.mrf.mxu0 }
 0x304   :  { %v475_v20 = vadd.f32 %v471_v18, %v447_v17 }
 0x306   :  { %705 = vtanh.f32 %v475_v20 }
 0x307   :  { %707 = vtanh.f32 %v474_v19 }
 0x30c   :  { %v706_v21 = vpop.eup %705 }
 0x30d   :  { %670 = vmatpush.msk.msrb.mxu1 %vm319_vm3, %v706_v21  ;;  %v708_v22 = vpop.eup %707 }
 0x30f   :  { %498 = vmatpush.msrb.mxu1 %v708_v22 }
 0x310   :  { %671 = vmatmul.msk.f32.vlgmr.msrb.gmra.mxu1 %vm312_vm2, %v877_v14 }
 0x318   :  { %672 = vmatmul.msk.f32.gmra.mxu1 %vm312_vm2, %v881_v15 }
 0x38d   :  { %v500_v23 = vpop.f32.mrf.mxu1 }
 0x38e   :  { %v506_v26 = vadd.f32 %v500_v23, %v891_v37  ;;  %v575_v37 = vld [vmem:[%s954_s5] sm:$0x7]  ;;  %s778_s5 = smov [#allocation6]  }
 0x38f   :  { %578 = vperm.xlu1 %688, %v575_v37   ;;  %s613_s28 = sshll.u32 %s778_s5, 4  ;;  %s614_s28 = int_to_ptr.vmem [resolvable:$true] %s613_s28 }
 0x395   :  { %v503_v25 = vpop.f32.mrf.mxu1 }
 0x396   :  { %v507_v27 = vadd.f32 %v503_v25, %v479_v24 }
 0x398   :  { %709 = vtanh.f32 %v507_v27 }
 0x399   :  { %711 = vtanh.f32 %v506_v26 }
 0x39e   :  { %v710_v28 = vpop.eup %709 }
 0x39f   :  { %673 = vmatpush.msk.msrb.mxu2 %vm319_vm3, %v710_v28  ;;  %v712_v29 = vpop.eup %711 }
 0x3a1   :  { %530 = vmatpush.msrb.mxu2 %v712_v29 }
 0x3a2   :  { %674 = vmatmul.msk.f32.vlgmr.msrb.gmra.mxu2 %vm312_vm2, %v877_v14 }
 0x3aa   :  { %675 = vmatmul.msk.f32.gmra.mxu2 %vm312_vm2, %v881_v15 }
 0x401   :  { %v579_v45 = vpop.permute.xlu1 %578 }
 0x425   :  { %v532_v30 = vpop.f32.mrf.mxu2 }
 0x426   :  { %v538_v33 = vadd.f32 %v532_v30, %v893_v40 }
 0x42d   :  { %v535_v32 = vpop.f32.mrf.mxu2 }
 0x42e   :  { %v539_v34 = vadd.f32 %v535_v32, %v511_v31 }
 0x430   :  { %713 = vtanh.f32 %v539_v34 }
 0x431   :  { %715 = vtanh.f32 %v538_v33 }
 0x436   :  { %v714_v35 = vpop.eup %713 }
 0x437   :  { %676 = vmatpush.msk.msrb.mxu3 %vm319_vm3, %v714_v35  ;;  %v716_v36 = vpop.eup %715 }
 0x439   :  { %562 = vmatpush.msrb.mxu3 %v716_v36 }
 0x43a   :  { %677 = vmatmul.msk.f32.vlgmr.msrb.gmra.mxu3 %vm312_vm2, %v877_v14  ;;  %v574_v14 = vld [vmem:[%s953_s4] sm:$0x7] }
 0x442   :  { %678 = vmatmul.msk.f32.gmra.mxu3 %vm312_vm2, %v881_v15 }
 0x4bd   :  { %v564_v38 = vpop.f32.mrf.mxu3 }
 0x4be   :  { %v570_v42 = vadd.f32 %v564_v38, %v895_v41 }
 0x4c5   :  { %v567_v40 = vpop.f32.mrf.mxu3 }
 0x4c6   :  { %v571_v43 = vadd.f32 %v567_v40, %v543_v39 }
 0x4c8   :  { %717 = vtanh.f32 %v571_v43 }
 0x4c9   :  { %719 = vtanh.f32 %v570_v42 }
 0x4ce   :  { %v718_v44 = vpop.eup %717 }
 0x4cf   :  { %679 = vmatpush.msk.msra.mxu0 %vm319_vm3, %v718_v44  ;;  %v720_v15 = vpop.eup %719 }
 0x4d1   :  { %602 = vmatpush.msra.mxu0 %v720_v15 }
 0x4d2   :  { %680 = vmatmul.msk.f32.vlgmr.msra.gmra.mxu0 %vm312_vm2, %v574_v14 }
 0x54f   :  { %v604_v41 = vpop.f32.mrf.mxu0 }
 0x550   :  { %v605_v46 = vadd.f32 %v604_v41, %v579_v45 }
 0x552   :  { %607 = vst [vmem:[#allocation6] sm:$0x7] %v605_v46 }
 0x553   :  { %618 = dma.vmem_to_hbm [thread:$0]  %s614_s28, 64, %s616_s2, [#allocation5]  }
 0x554   :  { %771 = dma.done.wait [#allocation5], 64  }
 0x555   :  { %772 = vsyncadd [#allocation5], 4294967232 }
 0x556   :  { %623 = vsyncpa [#allocation4], 1 }
 0x557   :  { %624 = vsyncpa [#allocation5], 1 }

</bundles_post_ra>
